<compile_context>
chip_gen: v5e
topology: v5e:2x2
jax: 0.10.0
libtpu: 0.0.40
codegen_flags: <defaults>
</compile_context>

<pallas_src>
import jax
import jax.numpy as jnp
import numpy as np
from jax import lax
from jax.experimental import pallas as pl
from jax.experimental.pallas import tpu as pltpu


# ----------------------------- Pallas kernel -------------------------------

def _fused_proj_kernel(xT_ref, w_ref, b_ref, s_ref, o_ref):
    """Fused proj_edge + proj_node + out-scale, feature-major / lane-dense.

    xT_ref : (d_hid, Nt)        f32  token features, tokens on the lane axis
    w_ref  : (2*d_hid+2, 2*d_hid) bf16
             rows [0, 2*d_hid)      = [W1_edge ; W1_node]   (cols [0, d_hid))
             rows [2*d_hid, +2)     = block-diag [w2_edge | 0 ; 0 | w2_node]
    b_ref  : (2*d_hid+2, 1)     f32  [b1_edge ; b1_node ; b2_edge ; b2_node]
    s_ref  : (2, Nt)            f32  row 0: weight_scale on edge tokens / 0 else
                                     row 1: bias_scale  on node tokens / 0 else
    o_ref  : (1, Nt)            f32  combined scaled projections
    """
    d_hid = xT_ref.shape[0]
    h2 = 2 * d_hid

    # bf16 MXU operands (native on v5e/v6e/v7x); f32 accumulation everywhere.
    xT = xT_ref[...].astype(jnp.bfloat16)              # (d_hid, Nt)
    w1 = w_ref[0:h2, 0:d_hid]                          # (2*d_hid, d_hid)   bf16
    w2 = w_ref[h2:, :]                                 # (2, 2*d_hid)       bf16
    b1 = b_ref[0:h2, :]                                # (2*d_hid, 1)       f32
    b2 = b_ref[h2:, :]                                 # (2, 1)             f32

    # Layer 1 for BOTH MLPs in one matmul (rows 0..d_hid-1 = edge MLP,
    # rows d_hid..2*d_hid-1 = node MLP, evaluated on every token).
    hT = jnp.dot(w1, xT, preferred_element_type=jnp.float32)     # (2*d_hid, Nt)
    hT = jnp.maximum(hT + b1, 0.0)                                # f32 epilogue (v5e-friendly)

    # Layer 2: block-diagonal -> row 0 = edge-MLP output, row 1 = node-MLP output.
    yT = jnp.dot(w2, hT.astype(jnp.bfloat16),
                 preferred_element_type=jnp.float32) + b2         # (2, Nt)

    # Per-token select + out-scale folded into one multiply; sum over the two
    # rows picks the MLP that owns each token (the other row's scale is 0).
    o_ref[...] = jnp.sum(yT * s_ref[...], axis=0, keepdims=True).astype(o_ref.dtype)


def fused_proj_pallas(xT, w_packed, b_packed, sel_scale):
    """Single-step, single-TC fused projection. 4 input DMAs + 1 output DMA."""
    _, n_tot = xT.shape
    ins = (xT, w_packed, b_packed, sel_scale)
    # TODO(synk): if token counts grow into the thousands, re-add a token grid
    # axis: 128-multiple tiles for v5e (4x128^2 MXU), 256 on the token dim for
    # v6e/v7x (2x256^2); budget tiles for v7x's 64 MiB physical / 32 MiB default
    # scoped VMEM (~512-1024 tokens per double-buffered tile, raise
    # vmem_limit_bytes explicitly) and only then mark the axis "parallel" for
    # dual-TC v7x.  At ~124 tokens a second core / extra grid steps are a
    # guaranteed regression, so keep the single-step single-TC kernel.
    return pl.pallas_call(
        _fused_proj_kernel,
        out_shape=jax.ShapeDtypeStruct((1, n_tot), xT.dtype),
        grid_spec=pltpu.PrefetchScalarGridSpec(
            num_scalar_prefetch=0,
            grid=(1,),
            in_specs=[pl.BlockSpec(a.shape, lambda i: (0, 0)) for a in ins],
            out_specs=pl.BlockSpec((1, n_tot), lambda i: (0, 0)),
        ),
        compiler_params=pltpu.CompilerParams(dimension_semantics=("arbitrary",)),
    )(*ins)


# --------------------- parameter packing (outside jit) ----------------------

def pack_proj_params(proj_edge_params, proj_node_params):
    """Pack the two 2-layer MLPs into one bf16 weight slab + one f32 bias
    column (built with numpy at init time -> zero runtime cost)."""
    w1e, b1e, w2e, b2e = [np.asarray(p, np.float32) for p in proj_edge_params]
    w1n, b1n, w2n, b2n = [np.asarray(p, np.float32) for p in proj_node_params]
    d_hid = w1e.shape[0]
    d_out = w2e.shape[0]
    assert d_out == 1, "lane-dense packing + graph_to_wb reshape assume d_out == 1"
    h2 = 2 * d_hid

    W = np.zeros((h2 + 2 * d_out, h2), np.float32)
    W[0:d_hid, 0:d_hid] = w1e                 # layer-1 edge
    W[d_hid:h2, 0:d_hid] = w1n                # layer-1 node
    W[h2:h2 + d_out, 0:d_hid] = w2e           # layer-2 block-diagonal
    W[h2 + d_out:, d_hid:h2] = w2n

    bvec = np.zeros((h2 + 2 * d_out, 1), np.float32)
    bvec[0:d_hid] = b1e
    bvec[d_hid:h2] = b1n
    bvec[h2:h2 + d_out] = b2e
    bvec[h2 + d_out:] = b2n

    # Weights bf16 (MXU operands), biases kept f32 (f32 epilogue on all chips).
    return jnp.asarray(W, dtype=jnp.bfloat16), jnp.asarray(bvec, dtype=jnp.float32)


# ------------------------------ JAX glue ------------------------------------

def graph_to_wb(edge_features, node_features, weights, biases):
    """Exact port of the reference graph_to_wb with normalize=False.
    NOTE: the reshape matches PyTorch .view semantics because d_out == 1."""
    new_weights, new_biases = [], []
    start = 0
    for w in weights:
        size = int(np.prod(w.shape[1:]))
        new_weights.append(edge_features[:, start:start + size].reshape(w.shape))
        start += size
    start = 0
    for b in biases:
        size = int(np.prod(b.shape[1:]))
        new_biases.append(node_features[:, start:start + size].reshape(b.shape))
        start += size
    return new_weights, new_biases


def _per_token_ids(sizes, base, n_tokens, zero_idx):
    """Token -> scale-vector index following graph_to_wb's slice order (tokens
    are consumed front-to-back per matrix); trailing unused tokens map to the
    zero slot so their (discarded) outputs get scale 0."""
    ids = np.full((n_tokens,), zero_idx, dtype=np.int32)
    seg = np.repeat(np.arange(len(sizes), dtype=np.int32), sizes) + base
    ids[: seg.size] = seg
    return ids


@jax.jit
def gnn_params_forward(node_features, edge_features, in_weights, in_biases,
                       w_packed, b_packed, weight_scale, bias_scale):
    B, n_edges, d_hid = edge_features.shape
    _, n_nodes, _ = node_features.shape
    d_out = (w_packed.shape[0] - 2 * d_hid) // 2
    assert d_out == 1, "lane-dense packing + graph_to_wb reshape assume d_out == 1"

    ne_tot, nn_tot = B * n_edges, B * n_nodes
    n_tot = ne_tot + nn_tot

    # One feature-major activation slab: tokens on the 128-lane axis, edge
    # tokens first then node tokens -> one input DMA, no in-kernel transpose.
    xT = jnp.concatenate([edge_features.reshape(ne_tot, d_hid),
                          node_features.reshape(nn_tot, d_hid)], axis=0).T

    # Fused out-scale rows via ONE gather from a trace-time-constant id matrix.
    # Row 0 selects the edge-MLP output with weight_scale (0 on node tokens);
    # row 1 selects the node-MLP output with bias_scale (0 on edge tokens).
    # The per-token layout mirrors graph_to_wb's consumption order (edge tokens
    # feed weights in order, node tokens feed biases in order; the node-token
    # tail beyond sum(node_sizes) is discarded by graph_to_wb and gets scale 0).
    n_mats = len(in_weights)
    zero_idx = 2 * n_mats
    edge_sizes = [int(np.prod(w.shape[1:])) for w in in_weights]
    node_sizes = [int(np.prod(b.shape[1:])) for b in in_biases]
    ids = np.full((2, n_tot), zero_idx, dtype=np.int32)
    ids[0, :ne_tot] = np.tile(_per_token_ids(edge_sizes, 0, n_edges, zero_idx), B)
    ids[1, ne_tot:] = np.tile(_per_token_ids(node_sizes, n_mats, n_nodes, zero_idx), B)
    scale_vec = jnp.concatenate([jnp.stack(weight_scale).astype(jnp.float32),
                                 jnp.stack(bias_scale).astype(jnp.float32),
                                 jnp.zeros((1,), jnp.float32)])
    sel_scale = scale_vec[ids]                                    # (2, n_tot)

    y_row = fused_proj_pallas(xT, w_packed, b_packed, sel_scale)  # (1, n_tot)

    # d_out == 1: the lane-dense row reshapes directly to token-major features.
    ef = y_row[0, :ne_tot].reshape(B, n_edges, d_out)
    nf = y_row[0, ne_tot:].reshape(B, n_nodes, d_out)
    return graph_to_wb(ef, nf, in_weights, in_biases)


def init_mlp(key, d_hid, d_out):
    """Parameters in PyTorch nn.Linear layout: W is [out, in], biases as columns."""
    k1, k2, k3, k4 = jax.random.split(key, 4)
    w1 = jax.random.normal(k1, (d_hid, d_hid), jnp.float32) / jnp.sqrt(d_hid)
    b1 = jax.random.normal(k2, (d_hid, 1), jnp.float32) * 0.01
    w2 = jax.random.normal(k3, (d_out, d_hid), jnp.float32) / jnp.sqrt(d_hid)
    b2 = jax.random.normal(k4, (d_out, 1), jnp.float32) * 0.01
    return w1, b1, w2, b2


def reference_forward(node_features, edge_features, in_weights, in_biases,
                      proj_edge_params, proj_node_params, weight_scale, bias_scale):
    """Pure-JAX mirror of the PyTorch forward (proj -> graph_to_wb -> scale),
    run at HIGHEST precision in f32 as ground truth."""
    def mlp(x, params):
        w1, b1, w2, b2 = params
        h = jnp.maximum(jnp.matmul(x, w1.T, precision=lax.Precision.HIGHEST) + b1[:, 0], 0.0)
        return jnp.matmul(h, w2.T, precision=lax.Precision.HIGHEST) + b2[:, 0]
    ef = mlp(edge_features, proj_edge_params)
    nf = mlp(node_features, proj_node_params)
    weights, biases = graph_to_wb(ef, nf, in_weights, in_biases)
    weights = [w * s for w, s in zip(weights, weight_scale)]
    biases = [b * s for b, s in zip(biases, bias_scale)]
    return weights, biases


# ------------------------------- main ----------------------------------------

if __name__ == "__main__":
    key = jax.random.PRNGKey(0)
    B = 2
    layer_layout = [2, 8, 4]          # nodes per layer of the target network
    d_hid, d_out = 32, 1              # d_out = 1 for per-scalar predictions
    out_scale = 0.01

    n_nodes = sum(layer_layout)                                                 # 14
    n_edges = sum(a * b for a, b in zip(layer_layout[:-1], layer_layout[1:]))   # 48

    keys = jax.random.split(key, 8)

    # inputs = (weights, biases) of the target network (shapes drive graph_to_wb)
    in_weights = [
        jax.random.normal(keys[0], (B, layer_layout[i], layer_layout[i + 1]), jnp.float32)
        for i in range(len(layer_layout) - 1)
    ]
    in_biases = [
        jax.random.normal(keys[1], (B, layer_layout[i + 1]), jnp.float32)
        for i in range(len(layer_layout) - 1)
    ]

    # Synthetic post-GNN node/edge features (see TODO(synk) above).
    node_features = jax.random.normal(keys[2], (B, n_nodes, d_hid), jnp.float32)
    edge_features = jax.random.normal(keys[3], (B, n_edges, d_hid), jnp.float32)

    proj_edge_params = init_mlp(keys[4], d_hid, d_out)
    proj_node_params = init_mlp(keys[5], d_hid, d_out)

    # Pack the 10 MLP parameters into 2 arrays once, outside jit (numpy).
    w_packed, b_packed = pack_proj_params(proj_edge_params, proj_node_params)

    n_mats = len(layer_layout) - 1
    weight_scale = [jnp.float32(out_scale) for _ in range(n_mats)]
    bias_scale = [jnp.float32(out_scale) for _ in range(n_mats)]

    weights, biases = gnn_params_forward(
        node_features, edge_features, in_weights, in_biases,
        w_packed, b_packed, weight_scale, bias_scale)
    jax.block_until_ready(weights)
    jax.block_until_ready(biases)

    # sanity: shapes must match the target network, values must match pure-JAX ref.
    assert all(w.shape == iw.shape for w, iw in zip(weights, in_weights))
    assert all(b.shape == ib.shape for b, ib in zip(biases, in_biases))
    ref_w, ref_b = reference_forward(
        node_features, edge_features, in_weights, in_biases,
        proj_edge_params, proj_node_params, weight_scale, bias_scale)
    # Tolerance reflects bf16 MXU operands (f32 accumulation) vs the f32
    # HIGHEST-precision reference; at K=32 the typical error is well inside this.
    for w, rw in zip(weights, ref_w):
        np.testing.assert_allclose(np.asarray(w), np.asarray(rw), rtol=1e-2, atol=2e-4)
    for b, rb in zip(biases, ref_b):
        np.testing.assert_allclose(np.asarray(b), np.asarray(rb), rtol=1e-2, atol=2e-4)

    print("KERNEL_OK")
</pallas_src>

<mosaic_0001>
module attributes {stable_mosaic.version = 11 : i64} {
  func.func @_fused_proj_kernel(%arg0: i32, %arg1: memref<32x124xf32, #tpu.memory_space<vmem>>, %arg2: memref<66x64xbf16, #tpu.memory_space<vmem>>, %arg3: memref<66x1xf32, #tpu.memory_space<vmem>>, %arg4: memref<2x124xf32, #tpu.memory_space<vmem>>, %arg5: memref<1x124xf32, #tpu.memory_space<vmem>>) attributes {dimension_semantics = [#tpu.dimension_semantics<arbitrary>], iteration_bounds = array<i64: 1>, scalar_prefetch = 0 : i64, scratch_operands = 0 : i64, tpu.core_type = #tpu.core_type<tc>, window_params = [{pipeline_mode = #tpu.pipeline_mode<synchronous>, transform_indices = @transform_0, window_bounds = array<i64: 32, 124>}, {pipeline_mode = #tpu.pipeline_mode<synchronous>, transform_indices = @transform_1, window_bounds = array<i64: 66, 64>}, {pipeline_mode = #tpu.pipeline_mode<synchronous>, transform_indices = @transform_2, window_bounds = array<i64: 66, 1>}, {pipeline_mode = #tpu.pipeline_mode<synchronous>, transform_indices = @transform_3, window_bounds = array<i64: 2, 124>}, {pipeline_mode = #tpu.pipeline_mode<synchronous>, transform_indices = @transform_4, window_bounds = array<i64: 1, 124>}]} {
    %c0 = arith.constant 0 : index
    %c0_0 = arith.constant 0 : index
    %0 = vector.load %arg1[%c0, %c0_0] : memref<32x124xf32, #tpu.memory_space<vmem>>, vector<32x124xf32>
    %1 = arith.truncf %0 : vector<32x124xf32> to vector<32x124xbf16>
    %c0_1 = arith.constant 0 : index
    %c0_2 = arith.constant 0 : index
    %2 = vector.load %arg2[%c0_1, %c0_2] : memref<66x64xbf16, #tpu.memory_space<vmem>>, vector<64x32xbf16>
    %c64 = arith.constant 64 : index
    %c0_3 = arith.constant 0 : index
    %3 = vector.load %arg2[%c64, %c0_3] : memref<66x64xbf16, #tpu.memory_space<vmem>>, vector<2x64xbf16>
    %c0_4 = arith.constant 0 : index
    %c0_5 = arith.constant 0 : index
    %4 = vector.load %arg3[%c0_4, %c0_5] : memref<66x1xf32, #tpu.memory_space<vmem>>, vector<64x1xf32>
    %c64_6 = arith.constant 64 : index
    %c0_7 = arith.constant 0 : index
    %5 = vector.load %arg3[%c64_6, %c0_7] : memref<66x1xf32, #tpu.memory_space<vmem>>, vector<2x1xf32>
    %cst = arith.constant dense<0.000000e+00> : vector<64x124xf32>
    %6 = tpu.matmul %2, %1, %cst {dimension_numbers = #tpu.dot_dimension_numbers<[1], [0], [0], [1], [0, 0, 1, 1], [], []>} : vector<64x32xbf16>, vector<32x124xbf16>, vector<64x124xf32> -> vector<64x124xf32>
    %7 = vector.broadcast %4 : vector<64x1xf32> to vector<64x124xf32>
    %8 = arith.addf %6, %7 : vector<64x124xf32>
    %cst_8 = arith.constant 0.000000e+00 : f32
    %9 = vector.broadcast %cst_8 : f32 to vector<64x124xf32>
    %10 = arith.maximumf %8, %9 : vector<64x124xf32>
    %11 = arith.truncf %10 : vector<64x124xf32> to vector<64x124xbf16>
    %cst_9 = arith.constant dense<0.000000e+00> : vector<2x124xf32>
    %12 = tpu.matmul %3, %11, %cst_9 {dimension_numbers = #tpu.dot_dimension_numbers<[1], [0], [0], [1], [0, 0, 1, 1], [], []>} : vector<2x64xbf16>, vector<64x124xbf16>, vector<2x124xf32> -> vector<2x124xf32>
    %13 = vector.broadcast %5 : vector<2x1xf32> to vector<2x124xf32>
    %14 = arith.addf %12, %13 : vector<2x124xf32>
    %c0_10 = arith.constant 0 : index
    %c0_11 = arith.constant 0 : index
    %15 = vector.load %arg4[%c0_10, %c0_11] : memref<2x124xf32, #tpu.memory_space<vmem>>, vector<2x124xf32>
    %16 = arith.mulf %14, %15 : vector<2x124xf32>
    %cst_12 = arith.constant dense<0.000000e+00> : vector<124xf32>
    %17 = vector.multi_reduction <add>, %16, %cst_12 [0] : vector<2x124xf32> to vector<124xf32>
    %18 = vector.shape_cast %17 : vector<124xf32> to vector<1x124xf32>
    %c0_13 = arith.constant 0 : index
    %c0_14 = arith.constant 0 : index
    %19 = vector.load %arg5[%c0_13, %c0_14] : memref<1x124xf32, #tpu.memory_space<vmem>>, vector<1x124xf32>
    tpu.vector_store %arg5[%c0_13, %c0_14], %18 {strides = array<i32>} : memref<1x124xf32, #tpu.memory_space<vmem>>, vector<1x124xf32>,
    return
  }
  func.func @transform_0(%arg0: i32) -> (i32, i32) {
    %c0_i32 = arith.constant 0 : i32
    %c0_i32_0 = arith.constant 0 : i32
    %c0_i32_1 = arith.constant 0 : i32
    return %c0_i32, %c0_i32_0 : i32, i32
  }
  func.func @transform_1(%arg0: i32) -> (i32, i32) {
    %c0_i32 = arith.constant 0 : i32
    %c0_i32_0 = arith.constant 0 : i32
    %c0_i32_1 = arith.constant 0 : i32
    return %c0_i32, %c0_i32_0 : i32, i32
  }
  func.func @transform_2(%arg0: i32) -> (i32, i32) {
    %c0_i32 = arith.constant 0 : i32
    %c0_i32_0 = arith.constant 0 : i32
    %c0_i32_1 = arith.constant 0 : i32
    return %c0_i32, %c0_i32_0 : i32, i32
  }
  func.func @transform_3(%arg0: i32) -> (i32, i32) {
    %c0_i32 = arith.constant 0 : i32
    %c0_i32_0 = arith.constant 0 : i32
    %c0_i32_1 = arith.constant 0 : i32
    return %c0_i32, %c0_i32_0 : i32, i32
  }
  func.func @transform_4(%arg0: i32) -> (i32, i32) {
    %c0_i32 = arith.constant 0 : i32
    %c0_i32_0 = arith.constant 0 : i32
    %c0_i32_1 = arith.constant 0 : i32
    return %c0_i32, %c0_i32_0 : i32, i32
  }
}

</mosaic_0001>

<bundles_post_ra>
// kernel: squeeze.2
= control target key start
LH: loop header
LB: loop body
LE: loop exit
PB: predicated region body
PF: predicated region fallthrough
CT: control target
= control target key end

     0   :  { %vm7_vm0 = vcmask 392192   ;;  %s39_s0 = inlined_call_operand.vmem [shape: f32[96], index: 0, kind: input, shape index: {}]   ;;  %s40_s1 = inlined_call_operand.vmem [shape: f32[2,48,1], index: 1, kind: output, shape index: {}]  }
   0x1   :  { %v4_v0 = vld [vmem:[%s39_s0] sm:$0x1]  ;;  %s22_s0 = smov 80  }
   0x2   :  { %5 = vst [vmem:[#allocation1] sm:$0x1] %v4_v0 }
   0x9   :  { %v9_v1 = vld [vmem:[#allocation1] sm:$0x1]  }
   0xa   :  { %v6_v2 = vld [vmem:[#allocation1] sm:$0x1]   ;;  %10 = vrot.lane.b32.xlu0 %v9_v1, %s22_s0 }
   0xb   :  { %8 = vst.msk [vmem:[#allocation0] sm:$0x1] %vm7_vm0, %v6_v2  }
  0x7c   :  { %v11_v3 = vpop.permute.xlu0 %10  }
  0x7d   :  { %14 = vst.msk [vmem:[#allocation0 + $0x1] sm:$0x1] %vm7_vm0, %v11_v3  }
  0x84   :  { %v17_v4 = vld [vmem:[#allocation0] sm:$0x3] }
  0x85   :  { %20 = vst [vmem:[%s40_s1] sm:$0x3] %v17_v4 }

// kernel: squeeze.3
= control target key start
LH: loop header
LB: loop body
LE: loop exit
PB: predicated region body
PF: predicated region fallthrough
CT: control target
= control target key end

     0   :  { %vm7_vm0 = vcmask 113664   ;;  %s39_s0 = inlined_call_operand.vmem [shape: f32[28], index: 0, kind: input, shape index: {}]   ;;  %s40_s1 = inlined_call_operand.vmem [shape: f32[2,14,1], index: 1, kind: output, shape index: {}]  }
   0x1   :  { %v4_v0 = vld [vmem:[%s39_s0] sm:$0x1]  ;;  %s22_s0 = smov 114  }
   0x2   :  { %5 = vst [vmem:[#allocation1] sm:$0x1] %v4_v0 }
   0x9   :  { %v9_v1 = vld [vmem:[#allocation1] sm:$0x1]  }
   0xa   :  { %v6_v2 = vld [vmem:[#allocation1] sm:$0x1]   ;;  %10 = vrot.lane.b32.xlu0 %v9_v1, %s22_s0 }
   0xb   :  { %8 = vst.msk [vmem:[#allocation0] sm:$0x1] %vm7_vm0, %v6_v2  }
  0x7c   :  { %v11_v3 = vpop.permute.xlu0 %10  }
  0x7d   :  { %14 = vst.msk [vmem:[#allocation0 + $0x1] sm:$0x1] %vm7_vm0, %v11_v3  }
  0x84   :  { %v17_v4 = vld [vmem:[#allocation0] sm:$0x3] }
  0x85   :  { %20 = vst [vmem:[%s40_s1] sm:$0x3] %v17_v4 }

// kernel: gnn_params_forward.1
= control target key start
LH: loop header
LB: loop body
LE: loop exit
PB: predicated region body
PF: predicated region fallthrough
CT: control target
= control target key end

     0   :  { %v227_v3 = vmov 0   ;;  %vm102_vm0 = vcmask 261120   ;;  %vm161_vm1 = vcmask 523264   ;;  %vm180_vm2 = vcmask 1008640   ;;  %s317_s0 = inlined_call_operand.vmem [shape: f32[32,124], index: 0, kind: input, shape index: {}]   ;;  %s318_s2 = inlined_call_operand.vmem [shape: f32[66,1], index: 2, kind: input, shape index: {}]   ;;  %s319_s1 = inlined_call_operand.vmem [shape: bf16[66,64], index: 1, kind: input, shape index: {}]   ;;  %s320_s3 = inlined_call_operand.vmem [shape: f32[2,124], index: 3, kind: input, shape index: {}]   ;;  %s321_s4 = inlined_call_operand.vmem [shape: f32[1,124], index: 4, kind: output, shape index: {}]  }
   0x1   :  { %v20_v0 = vld [vmem:[%s317_s0 + $0x10] sm:$0xff]  ;;  %v21_v1 = vld [vmem:[%s317_s0 + $0x18] sm:$0xff]  ;;  %v18_v2 = vld [vmem:[%s317_s0] sm:$0xff]  ;;  %225 = vset.pattern.permute.xlu1 %v227_v3  ;;  %224 = vset.pattern.permute.xlu0 %v227_v3  ;;  %vm188_vm3 = vcmask 1007616  }
   0x2   :  { %v23_v4 = vpack.c.bf16 %v21_v1, %v20_v0  ;;  %v19_v5 = vld [vmem:[%s317_s0 + $0x8] sm:$0xff]  ;;  %226 = vset.pattern.permute.xlu2 %v227_v3  ;;  %v39_v6 = vld [vmem:[%s318_s2 + $0x30] sm:$0xff]  ;;  %v37_v7 = vld [vmem:[%s318_s2 + $0x20] sm:$0xff] }
   0x3   :  { %v22_v8 = vpack.c.bf16 %v19_v5, %v18_v2  ;;  %74 = vperm.xlu0 %224, %v39_v6   ;;  %v35_v9 = vld [vmem:[%s318_s2 + $0x10] sm:$0xff]  ;;  %64 = vperm.xlu1 %225, %v37_v7   ;;  %v216_v10 = vld [vmem:[%s319_s1 + $0x8] sm:$0xff]  ;;  %v218_v11 = vld [vmem:[%s319_s1 + $0x18] sm:$0xff] }
   0x4   :  { %219 = vmatpush.bf16.msra.mxu2 %v23_v4  ;;  %220 = vmatpush.bf16.msra.mxu3 %v23_v4  ;;  %v215_v12 = vld [vmem:[%s319_s1] sm:$0xff]  ;;  %v40_v13 = vld [vmem:[%s318_s2 + $0x38] sm:$0xff]  ;;  %v38_v14 = vld [vmem:[%s318_s2 + $0x28] sm:$0xff] }
   0x5   :  { %121 = vmatpush.bf16.msra.mxu0 %v23_v4  ;;  %54 = vperm.xlu2 %226, %v35_v9   ;;  %v36_v15 = vld [vmem:[%s318_s2 + $0x18] sm:$0xff]  ;;  %v33_v16 = vld [vmem:[%s318_s2] sm:$0xff]  ;;  %v34_v17 = vld [vmem:[%s318_s2 + $0x8] sm:$0xff] }
   0x6   :  { %v41_v18 = vld [vmem:[%s318_s2 + $0x40] sm:$0x3]  ;;  %v217_v19 = vld [vmem:[%s319_s1 + $0x10] sm:$0xff] }
   0x7   :  { %v32_v56 = vld [vmem:[%s319_s1 + $0x20] sm:$0x1] }
   0x8   :  { %221 = vmatpush.bf16.msra.mxu2 %v22_v8  ;;  %222 = vmatpush.bf16.msra.mxu3 %v22_v8  ;;  %v178_v59 = vld [vmem:[%s320_s3] sm:$0x3] }
   0x9   :  { %122 = vmatpush.bf16.msra.mxu0 %v22_v8 }
   0xb   :  { %211 = vmatmul.msk.bf16.vlgmr.msra.gmra.mxu2 %vm102_vm0, %v216_v10  ;;  %213 = vmatmul.msk.bf16.vlgmr.msra.gmra.mxu3 %vm102_vm0, %v218_v11 }
   0xc   :  { %210 = vmatmul.msk.bf16.vlgmr.msra.gmra.mxu0 %vm102_vm0, %v215_v12  ;;  %79 = vperm.xlu0 %224, %v40_v13  }
   0xd   :  { %69 = vperm.xlu1 %225, %v38_v14   ;;  %59 = vperm.xlu2 %226, %v36_v15  }
  0x14   :  { %44 = vperm.xlu0 %224, %v33_v16  }
  0x15   :  { %49 = vperm.xlu1 %225, %v34_v17   ;;  %158 = vperm.xlu2 %226, %v41_v18  }
  0x1b   :  { %212 = vmatmul.msk.bf16.gmra.mxu2 %vm102_vm0, %v217_v19 }
  0x5f   :  { %v55_v31 = vpop.permute.xlu2 %54 }
  0x67   :  { %v60_v36 = vpop.permute.xlu2 %59 }
  0x6f   :  { %v159_v57 = vpop.permute.xlu2 %158 }
  0x75   :  { %v75_v20 = vpop.permute.xlu0 %74  ;;  %v65_v23 = vpop.permute.xlu1 %64 }
  0x7e   :  { %v80_v25 = vpop.permute.xlu0 %79 }
  0x7f   :  { %v70_v33 = vpop.permute.xlu1 %69 }
  0x86   :  { %v45_v40 = vpop.permute.xlu0 %44 }
  0x87   :  { %v50_v42 = vpop.permute.xlu1 %49 }
  0x89   :  { %v124_v34 = vpop.f32.mrf.mxu0 }
  0x8a   :  { %v125_v48 = vadd.f32 %v124_v34, %v45_v40 }
  0x8c   :  { %v144_v52 = vmax.f32 %v125_v48, 0.0 }
  0x8e   :  { %v129_v21 = vpop.f32.mrf.mxu2  ;;  %v139_v22 = vpop.f32.mrf.mxu3 }
  0x8f   :  { %v140_v24 = vadd.f32 %v139_v22, %v75_v20  ;;  %v130_v44 = vadd.f32 %v129_v21, %v55_v31 }
  0x91   :  { %v150_v28 = vmax.f32 %v140_v24, 0.0  ;;  %v126_v43 = vpop.f32.mrf.mxu0  ;;  %v146_v51 = vmax.f32 %v130_v44, 0.0 }
  0x92   :  { %v127_v49 = vadd.f32 %v126_v43, %v50_v42 }
  0x94   :  { %v145_v53 = vmax.f32 %v127_v49, 0.0 }
  0x96   :  { %v131_v26 = vpop.f32.mrf.mxu2  ;;  %v141_v27 = vpop.f32.mrf.mxu3  ;;  %v152_v55 = vpack.c.bf16 %v145_v53, %v144_v52 }
  0x97   :  { %v142_v29 = vadd.f32 %v141_v27, %v80_v25  ;;  %v132_v39 = vadd.f32 %v131_v26, %v60_v36 }
  0x99   :  { %v151_v30 = vmax.f32 %v142_v29, 0.0  ;;  %v147_v47 = vmax.f32 %v132_v39, 0.0 }
  0x9b   :  { %v155_v32 = vpack.c.bf16 %v151_v30, %v150_v28  ;;  %v153_v54 = vpack.c.bf16 %v147_v47, %v146_v51 }
  0x9d   :  { %169 = vmatpush.bf16.msra.mxu1 %v155_v32 }
  0x9e   :  { %v134_v35 = vpop.f32.mrf.mxu2 }
  0x9f   :  { %v135_v37 = vadd.f32 %v134_v35, %v65_v23 }
  0xa1   :  { %v148_v45 = vmax.f32 %v135_v37, 0.0 }
  0xa6   :  { %v136_v38 = vpop.f32.mrf.mxu2 }
  0xa7   :  { %v137_v41 = vadd.f32 %v136_v38, %v70_v33 }
  0xa9   :  { %v149_v46 = vmax.f32 %v137_v41, 0.0 }
  0xab   :  { %v154_v50 = vpack.c.bf16 %v149_v46, %v148_v45 }
  0xad   :  { %170 = vmatpush.bf16.msra.mxu1 %v154_v50 }
  0xb1   :  { %171 = vmatpush.bf16.msra.mxu1 %v153_v54 }
  0xb5   :  { %172 = vmatpush.bf16.msra.mxu1 %v152_v55 }
  0xb8   :  { %214 = vmatmul.msk.bf16.vlgmr.msra.gmra.mxu1 %vm161_vm1, %v32_v56 }
 0x135   :  { %v174_v58 = vpop.f32.mrf.mxu1 }
 0x136   :  { %v175_v60 = vadd.f32 %v174_v58, %v159_v57 }
 0x138   :  { %v179_v61 = vmul.f32 %v178_v59, %v175_v60 }
 0x13a   :  { %v181_v62 = vsel %vm180_vm2, %v179_v61, 0.0 }
 0x13b   :  { %v182_v63 = vrot.slane %v181_v62, 4 }
 0x13d   :  { %v183_v0 = vadd.f32 %v182_v63, %v181_v62  ;;  %v176_v1 = vpop.f32.mrf.mxu1 }
 0x13f   :  { %v184_v2 = vrot.slane %v183_v0, 2 }
 0x141   :  { %v185_v3 = vadd.f32 %v184_v2, %v183_v0 }
 0x143   :  { %v186_v4 = vrot.slane %v185_v3, 1 }
 0x145   :  { %v187_v5 = vadd.f32 %v186_v4, %v185_v3 }
 0x147   :  { %189 = vst.msk [vmem:[%s321_s4] sm:$0x1] %vm188_vm3, %v187_v5 }

</bundles_post_ra>
